<compile_context>
chip_gen: v7x
topology: tpu7x:2x2x1
jax: 0.10.0
libtpu: 0.0.40
codegen_flags: <defaults>
</compile_context>

<pallas_src>
import jax
import jax.numpy as jnp
import numpy as np
from jax.experimental import pallas as pl
from jax.experimental.pallas import tpu as pltpu

BN_EPS = 1e-5
_VMEM_LIMIT = 32 * 1024 * 1024   # scoped limit safe on v5e/v6e (128 MiB) and v7x (64 MiB)
_TILE_BUDGET = 8 * 1024 * 1024   # double-buffered per-step payload target
_T_CAP = 4096


def _rows_per_tile(H, W, C, Cout):
    """Rows per spatial tile: whole rows, T = Th*W as large as possible under a
    ~8 MiB double-buffered payload budget, preferring lane-aligned T (mult of 128)."""
    max_t = min(_T_CAP, max(W, _TILE_BUDGET // (8 * (C + 4 * Cout))))
    best_any = None
    for th in range(H, 0, -1):
        if H % th:
            continue
        t = th * W
        if t > max_t:
            continue
        if best_any is None:
            best_any = th
        if t % 128 == 0:
            return th
    return best_any if best_any is not None else 1


def _expansion_group(T, W):
    """Lane-group G for the upsample expansion: a multiple of W dividing T,
    >= 128 if possible, capped so the (G, 4G) constant stays small."""
    divs = [d for d in range(W, T + 1, W) if T % d == 0]
    for d in divs:
        if 128 <= d <= 1024:
            return d
    small = [d for d in divs if d <= 1024]
    return small[-1] if small else divs[0]


def _expansion_matrix(G, W):
    """(G, 4G) 0/1 matrix: input (row h, col w) of a G-lane row group -> its four
    2x-nearest output positions in the flat [2 rows x 2W] slab of that group."""
    p = np.arange(G)
    base = (4 * (p // W) * W + 2 * (p % W))[:, None]          # (G, 1)
    q = np.arange(4 * G)[None, :]                             # (1, 4G)
    hit = (q == base) | (q == base + 1) | (q == base + 2 * W) | (q == base + 2 * W + 1)
    return hit.astype(np.float32)


def gen_transition(x, w, gamma, beta):
    """x: (N, C, H, W) f32, w: (C, Cout) (ConvTranspose2d weight[:, :, 0, 0]),
    gamma/beta: (C,).  Returns (N, Cout, 2H, 2W) f32."""
    N, C, H, W = x.shape
    Cout = w.shape[1]
    HW = H * W

    Th = _rows_per_tile(H, W, C, Cout)
    T = Th * W
    n_t = HW // T
    G = _expansion_group(T, W)
    n_groups = T // G
    lane_chunks = T // 128 if T % 128 == 0 else 0
    inv_cnt = 1.0 / float(N * HW)

    # NCHW is already channel-major: this is a free view, no HBM transpose.
    x3 = x.reshape(N, C, HW)

    # ------------------ Pass 1: per-batch BN statistics ------------------
    def stats_kernel(x_ref, sum_ref, sq_ref, acc_s, acc_q):
        t = pl.program_id(1)

        @pl.when(t == 0)
        def _init():
            acc_s[...] = jnp.zeros_like(acc_s)
            acc_q[...] = jnp.zeros_like(acc_q)

        xv = x_ref[...].astype(jnp.float32)                       # (C, T)
        if lane_chunks:
            # Lane-wide VPU accumulation: no per-tile cross-lane reduce, no
            # masked (C,1) stores inside the hot loop.
            s = xv[:, 0:128]
            q = s * s
            for i in range(1, lane_chunks):
                c = xv[:, i * 128:(i + 1) * 128]
                s = s + c
                q = q + c * c
            acc_s[...] += s
            acc_q[...] += q
        else:  # T not lane-aligned (tiny feature maps): plain reduce
            acc_s[:, 0:1] += jnp.sum(xv, axis=-1, keepdims=True)
            acc_q[:, 0:1] += jnp.sum(xv * xv, axis=-1, keepdims=True)

        @pl.when(t == n_t - 1)
        def _finalize():
            sum_ref[...] = jnp.sum(acc_s[...], axis=-1, keepdims=True)
            sq_ref[...] = jnp.sum(acc_q[...], axis=-1, keepdims=True)

    sum_c, sumsq_c = pl.pallas_call(
        stats_kernel,
        out_shape=(jax.ShapeDtypeStruct((N, C, 1), jnp.float32),
                   jax.ShapeDtypeStruct((N, C, 1), jnp.float32)),
        grid=(N, n_t),
        in_specs=[pl.BlockSpec((None, C, T), lambda n, t: (n, 0, t))],
        out_specs=(pl.BlockSpec((None, C, 1), lambda n, t: (n, 0, 0)),
                   pl.BlockSpec((None, C, 1), lambda n, t: (n, 0, 0))),
        scratch_shapes=[pltpu.VMEM((C, 128), jnp.float32),
                        pltpu.VMEM((C, 128), jnp.float32)],
        compiler_params=pltpu.CompilerParams(
            dimension_semantics=("parallel", "arbitrary"),
            vmem_limit_bytes=_VMEM_LIMIT),
    )(x3)

    gamma2 = gamma.reshape(C, 1).astype(jnp.float32)
    beta2 = beta.reshape(C, 1).astype(jnp.float32)
    wt = w.T.astype(jnp.float32)                     # (Cout, C)
    eg = jnp.asarray(_expansion_matrix(G, W))        # (G, 4G) baked constant

    # -------- Pass 2: folded BN + ReLU + 1x1 conv + fused 2x upsample --------
    def fused_kernel(sum_ref, sq_ref, gamma_ref, beta_ref, wt_ref, eg_ref,
                     x_ref, o_ref):
        # BN batch stats -> folded scale/shift (tiny; recomputed per grid step
        # so nothing sits on the inter-kernel critical path).
        s1 = sum_ref[0]
        s2 = sq_ref[0]
        for n in range(1, N):
            s1 = s1 + sum_ref[n]
            s2 = s2 + sq_ref[n]
        mean = s1 * inv_cnt
        var = jnp.maximum(s2 * inv_cnt - mean * mean, 0.0)
        scale = gamma_ref[...] * jax.lax.rsqrt(var + BN_EPS)      # (C, 1)
        shift = beta_ref[...] - mean * scale

        xv = x_ref[...].astype(jnp.float32)                       # (C, T) lane-dense
        xr = jnp.maximum(xv * scale + shift, 0.0)

        wt_v = wt_ref[...]
        if C <= 32:
            # Tiny channel count: VPU broadcast-FMAs (MXU would be >95% padding).
            y = wt_v[:, 0:1] * xr[0:1, :]
            for c in range(1, C):
                y = y + wt_v[:, c:c + 1] * xr[c:c + 1, :]         # (Cout, T)
        else:
            y = jnp.dot(wt_v, xr, preferred_element_type=jnp.float32)

        # Fused 2x nearest upsample: per lane-aligned row group, one tiny
        # (Cout, G) x (G, 4G) expansion dot -> one contiguous lane-dense store
        # of the interleaved (2 rows x 2W per input row) flat output slab.
        eg_v = eg_ref[...]
        for gi in range(n_groups):
            seg = y[:, gi * G:(gi + 1) * G]                       # (Cout, G)
            o_ref[:, gi * 4 * G:(gi + 1) * 4 * G] = jnp.dot(
                seg, eg_v, preferred_element_type=jnp.float32).astype(o_ref.dtype)

    out_flat = pl.pallas_call(
        fused_kernel,
        out_shape=jax.ShapeDtypeStruct((N, Cout, 4 * HW), jnp.float32),
        grid=(N, n_t),
        in_specs=[
            pl.BlockSpec((N, C, 1), lambda n, t: (0, 0, 0)),      # per-batch sums
            pl.BlockSpec((N, C, 1), lambda n, t: (0, 0, 0)),      # per-batch sumsq
            pl.BlockSpec((C, 1), lambda n, t: (0, 0)),            # gamma
            pl.BlockSpec((C, 1), lambda n, t: (0, 0)),            # beta
            pl.BlockSpec((Cout, C), lambda n, t: (0, 0)),         # w^T
            pl.BlockSpec((G, 4 * G), lambda n, t: (0, 0)),        # expansion const
            pl.BlockSpec((None, C, T), lambda n, t: (n, 0, t)),   # x tile
        ],
        out_specs=pl.BlockSpec((None, Cout, 4 * T), lambda n, t: (n, 0, t)),
        compiler_params=pltpu.CompilerParams(
            dimension_semantics=("parallel", "parallel"),
            vmem_limit_bytes=_VMEM_LIMIT),
    )(sum_c, sumsq_c, gamma2, beta2, wt, eg, x3)

    # (N, Cout, 4*H*W) is exactly (N, Cout, 2H, 2W) in memory -> free reshape.
    return out_flat.reshape(N, Cout, 2 * H, 2 * W)


def _reference(x, w, gamma, beta):
    # Pure-JAX reference mirroring the PyTorch forward (training-mode BN).
    mean = jnp.mean(x, axis=(0, 2, 3), keepdims=True)
    var = jnp.mean((x - mean) ** 2, axis=(0, 2, 3), keepdims=True)
    xn = (x - mean) / jnp.sqrt(var + BN_EPS)
    xn = xn * gamma[None, :, None, None] + beta[None, :, None, None]
    xr = jnp.maximum(xn, 0.0)
    y = jnp.einsum("nchw,co->nohw", xr, w)
    y = jnp.repeat(jnp.repeat(y, 2, axis=2), 2, axis=3)
    return y


if __name__ == "__main__":
    key = jax.random.PRNGKey(0)
    k_x, k_w, k_g, k_b = jax.random.split(key, 4)

    N, C, H, W = 2, 4, 16, 16
    Cout = 8

    x = jax.random.normal(k_x, (N, C, H, W), dtype=jnp.float32)
    # ConvTranspose2d weight has shape (C_in, C_out, 1, 1); we keep its (C, Cout) core.
    w = jax.random.normal(k_w, (C, Cout), dtype=jnp.float32) * 0.1
    gamma = 1.0 + 0.1 * jax.random.normal(k_g, (C,), dtype=jnp.float32)
    beta = 0.1 * jax.random.normal(k_b, (C,), dtype=jnp.float32)

    fn = jax.jit(gen_transition)
    out = jax.block_until_ready(fn(x, w, gamma, beta))

    ref = _reference(x, w, gamma, beta)
    assert out.shape == (N, Cout, 2 * H, 2 * W), out.shape
    max_err = float(jnp.max(jnp.abs(out - ref)))
    assert jnp.allclose(out, ref, atol=1e-4, rtol=1e-3), max_err

    print("KERNEL_OK")
</pallas_src>

<mosaic_0001>
module attributes {stable_mosaic.version = 11 : i64} {
  func.func @stats_kernel(%arg0: i32, %arg1: i32, %arg2: memref<1x4x256xf32, #tpu.memory_space<vmem>>, %arg3: memref<1x4x1xf32, #tpu.memory_space<vmem>>, %arg4: memref<1x4x1xf32, #tpu.memory_space<vmem>>, %arg5: memref<4x128xf32, #tpu.memory_space<vmem>>, %arg6: memref<4x128xf32, #tpu.memory_space<vmem>>) attributes {dimension_semantics = [#tpu.dimension_semantics<parallel>, #tpu.dimension_semantics<arbitrary>], iteration_bounds = array<i64: 2, 1>, scalar_prefetch = 0 : i64, scratch_operands = 2 : i64, tpu.core_type = #tpu.core_type<tc>, window_params = [{transform_indices = @transform_0, window_bounds = array<i64: 1, 4, 256>}, {transform_indices = @transform_1, window_bounds = array<i64: 1, 4, 1>}, {transform_indices = @transform_2, window_bounds = array<i64: 1, 4, 1>}]} {
    %c0_i32 = arith.constant 0 : i32
    %0 = arith.cmpi eq, %arg1, %c0_i32 : i32
    %1 = arith.extui %0 : i1 to i32
    %c0_i32_0 = arith.constant 0 : i32
    %2 = arith.cmpi ne, %1, %c0_i32_0 : i32
    scf.if %2 {
      %cst = arith.constant 0.000000e+00 : f32
      %20 = vector.broadcast %cst : f32 to vector<4x128xf32>
      %c0_13 = arith.constant 0 : index
      %c0_14 = arith.constant 0 : index
      %21 = vector.load %arg5[%c0_13, %c0_14] : memref<4x128xf32, #tpu.memory_space<vmem>>, vector<4x128xf32>
      tpu.vector_store %arg5[%c0_13, %c0_14], %20 {strides = array<i32>} : memref<4x128xf32, #tpu.memory_space<vmem>>, vector<4x128xf32>,
      %cst_15 = arith.constant 0.000000e+00 : f32
      %22 = vector.broadcast %cst_15 : f32 to vector<4x128xf32>
      %c0_16 = arith.constant 0 : index
      %c0_17 = arith.constant 0 : index
      %23 = vector.load %arg6[%c0_16, %c0_17] : memref<4x128xf32, #tpu.memory_space<vmem>>, vector<4x128xf32>
      tpu.vector_store %arg6[%c0_16, %c0_17], %22 {strides = array<i32>} : memref<4x128xf32, #tpu.memory_space<vmem>>, vector<4x128xf32>,
    } else {
    }
    %c0 = arith.constant 0 : index
    %c0_1 = arith.constant 0 : index
    %c0_2 = arith.constant 0 : index
    %3 = vector.load %arg2[%c0, %c0_1, %c0_2] : memref<1x4x256xf32, #tpu.memory_space<vmem>>, vector<1x4x256xf32>
    %4 = vector.shape_cast %3 : vector<1x4x256xf32> to vector<4x256xf32>
    %5 = vector.extract_strided_slice %4 {offsets = [0, 0], sizes = [4, 128], strides = [1, 1]} : vector<4x256xf32> to vector<4x128xf32>
    %6 = arith.mulf %5, %5 : vector<4x128xf32>
    %7 = vector.extract_strided_slice %4 {offsets = [0, 128], sizes = [4, 128], strides = [1, 1]} : vector<4x256xf32> to vector<4x128xf32>
    %8 = arith.addf %5, %7 : vector<4x128xf32>
    %9 = arith.mulf %7, %7 : vector<4x128xf32>
    %10 = arith.addf %6, %9 : vector<4x128xf32>
    %c0_3 = arith.constant 0 : index
    %c0_4 = arith.constant 0 : index
    %11 = vector.load %arg5[%c0_3, %c0_4] : memref<4x128xf32, #tpu.memory_space<vmem>>, vector<4x128xf32>
    %12 = arith.addf %11, %8 : vector<4x128xf32>
    %c0_5 = arith.constant 0 : index
    %c0_6 = arith.constant 0 : index
    %13 = vector.load %arg5[%c0_5, %c0_6] : memref<4x128xf32, #tpu.memory_space<vmem>>, vector<4x128xf32>
    tpu.vector_store %arg5[%c0_5, %c0_6], %12 {strides = array<i32>} : memref<4x128xf32, #tpu.memory_space<vmem>>, vector<4x128xf32>,
    %c0_7 = arith.constant 0 : index
    %c0_8 = arith.constant 0 : index
    %14 = vector.load %arg6[%c0_7, %c0_8] : memref<4x128xf32, #tpu.memory_space<vmem>>, vector<4x128xf32>
    %15 = arith.addf %14, %10 : vector<4x128xf32>
    %c0_9 = arith.constant 0 : index
    %c0_10 = arith.constant 0 : index
    %16 = vector.load %arg6[%c0_9, %c0_10] : memref<4x128xf32, #tpu.memory_space<vmem>>, vector<4x128xf32>
    tpu.vector_store %arg6[%c0_9, %c0_10], %15 {strides = array<i32>} : memref<4x128xf32, #tpu.memory_space<vmem>>, vector<4x128xf32>,
    %c0_i32_11 = arith.constant 0 : i32
    %17 = arith.cmpi eq, %arg1, %c0_i32_11 : i32
    %18 = arith.extui %17 : i1 to i32
    %c0_i32_12 = arith.constant 0 : i32
    %19 = arith.cmpi ne, %18, %c0_i32_12 : i32
    scf.if %19 {
      %c0_13 = arith.constant 0 : index
      %c0_14 = arith.constant 0 : index
      %20 = vector.load %arg5[%c0_13, %c0_14] : memref<4x128xf32, #tpu.memory_space<vmem>>, vector<4x128xf32>
      %cst = arith.constant dense<0.000000e+00> : vector<4xf32>
      %21 = vector.multi_reduction <add>, %20, %cst [1] : vector<4x128xf32> to vector<4xf32>
      %22 = vector.shape_cast %21 : vector<4xf32> to vector<4x1xf32>
      %c0_15 = arith.constant 0 : index
      %c0_16 = arith.constant 0 : index
      %c0_17 = arith.constant 0 : index
      %23 = vector.load %arg3[%c0_15, %c0_16, %c0_17] : memref<1x4x1xf32, #tpu.memory_space<vmem>>, vector<1x4x1xf32>
      %24 = vector.shape_cast %23 : vector<1x4x1xf32> to vector<4x1xf32>
      %25 = vector.shape_cast %22 : vector<4x1xf32> to vector<1x4x1xf32>
      tpu.vector_store %arg3[%c0_15, %c0_16, %c0_17], %25 {strides = array<i32>} : memref<1x4x1xf32, #tpu.memory_space<vmem>>, vector<1x4x1xf32>,
      %c0_18 = arith.constant 0 : index
      %c0_19 = arith.constant 0 : index
      %26 = vector.load %arg6[%c0_18, %c0_19] : memref<4x128xf32, #tpu.memory_space<vmem>>, vector<4x128xf32>
      %cst_20 = arith.constant dense<0.000000e+00> : vector<4xf32>
      %27 = vector.multi_reduction <add>, %26, %cst_20 [1] : vector<4x128xf32> to vector<4xf32>
      %28 = vector.shape_cast %27 : vector<4xf32> to vector<4x1xf32>
      %c0_21 = arith.constant 0 : index
      %c0_22 = arith.constant 0 : index
      %c0_23 = arith.constant 0 : index
      %29 = vector.load %arg4[%c0_21, %c0_22, %c0_23] : memref<1x4x1xf32, #tpu.memory_space<vmem>>, vector<1x4x1xf32>
      %30 = vector.shape_cast %29 : vector<1x4x1xf32> to vector<4x1xf32>
      %31 = vector.shape_cast %28 : vector<4x1xf32> to vector<1x4x1xf32>
      tpu.vector_store %arg4[%c0_21, %c0_22, %c0_23], %31 {strides = array<i32>} : memref<1x4x1xf32, #tpu.memory_space<vmem>>, vector<1x4x1xf32>,
    } else {
    }
    return
  }
  func.func @transform_0(%arg0: i32, %arg1: i32) -> (i32, i32, i32) {
    %c0_i32 = arith.constant 0 : i32
    %c0_i32_0 = arith.constant 0 : i32
    return %arg0, %c0_i32, %arg1 : i32, i32, i32
  }
  func.func @transform_1(%arg0: i32, %arg1: i32) -> (i32, i32, i32) {
    %c0_i32 = arith.constant 0 : i32
    %c0_i32_0 = arith.constant 0 : i32
    %c0_i32_1 = arith.constant 0 : i32
    return %arg0, %c0_i32, %c0_i32_0 : i32, i32, i32
  }
  func.func @transform_2(%arg0: i32, %arg1: i32) -> (i32, i32, i32) {
    %c0_i32 = arith.constant 0 : i32
    %c0_i32_0 = arith.constant 0 : i32
    %c0_i32_1 = arith.constant 0 : i32
    return %arg0, %c0_i32, %c0_i32_0 : i32, i32, i32
  }
}

module attributes {stable_mosaic.version = 11 : i64} {
  func.func @fused_kernel(%arg0: i32, %arg1: i32, %arg2: memref<2x4x1xf32, #tpu.memory_space<vmem>>, %arg3: memref<2x4x1xf32, #tpu.memory_space<vmem>>, %arg4: memref<4x1xf32, #tpu.memory_space<vmem>>, %arg5: memref<4x1xf32, #tpu.memory_space<vmem>>, %arg6: memref<8x4xf32, #tpu.memory_space<vmem>>, %arg7: memref<128x512xf32, #tpu.memory_space<vmem>>, %arg8: memref<1x4x256xf32, #tpu.memory_space<vmem>>, %arg9: memref<1x8x1024xf32, #tpu.memory_space<vmem>>) attributes {dimension_semantics = [#tpu.dimension_semantics<parallel>, #tpu.dimension_semantics<parallel>], iteration_bounds = array<i64: 2, 1>, scalar_prefetch = 0 : i64, scratch_operands = 0 : i64, tpu.core_type = #tpu.core_type<tc>, window_params = [{pipeline_mode = #tpu.pipeline_mode<synchronous>, transform_indices = @transform_0, window_bounds = array<i64: 2, 4, 1>}, {pipeline_mode = #tpu.pipeline_mode<synchronous>, transform_indices = @transform_1, window_bounds = array<i64: 2, 4, 1>}, {pipeline_mode = #tpu.pipeline_mode<synchronous>, transform_indices = @transform_2, window_bounds = array<i64: 4, 1>}, {pipeline_mode = #tpu.pipeline_mode<synchronous>, transform_indices = @transform_3, window_bounds = array<i64: 4, 1>}, {pipeline_mode = #tpu.pipeline_mode<synchronous>, transform_indices = @transform_4, window_bounds = array<i64: 8, 4>}, {pipeline_mode = #tpu.pipeline_mode<synchronous>, transform_indices = @transform_5, window_bounds = array<i64: 128, 512>}, {transform_indices = @transform_6, window_bounds = array<i64: 1, 4, 256>}, {transform_indices = @transform_7, window_bounds = array<i64: 1, 8, 1024>}]} {
    %c0 = arith.constant 0 : index
    %c0_0 = arith.constant 0 : index
    %c0_1 = arith.constant 0 : index
    %0 = vector.load %arg2[%c0, %c0_0, %c0_1] : memref<2x4x1xf32, #tpu.memory_space<vmem>>, vector<1x4x1xf32>
    %1 = vector.shape_cast %0 : vector<1x4x1xf32> to vector<4x1xf32>
    %c0_2 = arith.constant 0 : index
    %c0_3 = arith.constant 0 : index
    %c0_4 = arith.constant 0 : index
    %2 = vector.load %arg3[%c0_2, %c0_3, %c0_4] : memref<2x4x1xf32, #tpu.memory_space<vmem>>, vector<1x4x1xf32>
    %3 = vector.shape_cast %2 : vector<1x4x1xf32> to vector<4x1xf32>
    %c1 = arith.constant 1 : index
    %c0_5 = arith.constant 0 : index
    %c0_6 = arith.constant 0 : index
    %4 = vector.load %arg2[%c1, %c0_5, %c0_6] : memref<2x4x1xf32, #tpu.memory_space<vmem>>, vector<1x4x1xf32>
    %5 = vector.shape_cast %4 : vector<1x4x1xf32> to vector<4x1xf32>
    %6 = arith.addf %1, %5 : vector<4x1xf32>
    %c1_7 = arith.constant 1 : index
    %c0_8 = arith.constant 0 : index
    %c0_9 = arith.constant 0 : index
    %7 = vector.load %arg3[%c1_7, %c0_8, %c0_9] : memref<2x4x1xf32, #tpu.memory_space<vmem>>, vector<1x4x1xf32>
    %8 = vector.shape_cast %7 : vector<1x4x1xf32> to vector<4x1xf32>
    %9 = arith.addf %3, %8 : vector<4x1xf32>
    %cst = arith.constant 0.001953125 : f32
    %10 = vector.broadcast %cst : f32 to vector<4x1xf32>
    %11 = arith.mulf %6, %10 : vector<4x1xf32>
    %cst_10 = arith.constant 0.001953125 : f32
    %12 = vector.broadcast %cst_10 : f32 to vector<4x1xf32>
    %13 = arith.mulf %9, %12 : vector<4x1xf32>
    %14 = arith.mulf %11, %11 : vector<4x1xf32>
    %15 = arith.subf %13, %14 : vector<4x1xf32>
    %cst_11 = arith.constant 0.000000e+00 : f32
    %16 = vector.broadcast %cst_11 : f32 to vector<4x1xf32>
    %17 = arith.maximumf %15, %16 : vector<4x1xf32>
    %c0_12 = arith.constant 0 : index
    %c0_13 = arith.constant 0 : index
    %18 = vector.load %arg4[%c0_12, %c0_13] : memref<4x1xf32, #tpu.memory_space<vmem>>, vector<4x1xf32>
    %cst_14 = arith.constant 9.99999974E-6 : f32
    %19 = vector.broadcast %cst_14 : f32 to vector<4x1xf32>
    %20 = arith.addf %17, %19 : vector<4x1xf32>
    %21 = math.rsqrt %20 : vector<4x1xf32>
    %22 = arith.mulf %18, %21 : vector<4x1xf32>
    %c0_15 = arith.constant 0 : index
    %c0_16 = arith.constant 0 : index
    %23 = vector.load %arg5[%c0_15, %c0_16] : memref<4x1xf32, #tpu.memory_space<vmem>>, vector<4x1xf32>
    %24 = arith.mulf %11, %22 : vector<4x1xf32>
    %25 = arith.subf %23, %24 : vector<4x1xf32>
    %c0_17 = arith.constant 0 : index
    %c0_18 = arith.constant 0 : index
    %c0_19 = arith.constant 0 : index
    %26 = vector.load %arg8[%c0_17, %c0_18, %c0_19] : memref<1x4x256xf32, #tpu.memory_space<vmem>>, vector<1x4x256xf32>
    %27 = vector.shape_cast %26 : vector<1x4x256xf32> to vector<4x256xf32>
    %28 = vector.broadcast %22 : vector<4x1xf32> to vector<4x256xf32>
    %29 = arith.mulf %27, %28 : vector<4x256xf32>
    %30 = vector.broadcast %25 : vector<4x1xf32> to vector<4x256xf32>
    %31 = arith.addf %29, %30 : vector<4x256xf32>
    %cst_20 = arith.constant 0.000000e+00 : f32
    %32 = vector.broadcast %cst_20 : f32 to vector<4x256xf32>
    %33 = arith.maximumf %31, %32 : vector<4x256xf32>
    %c0_21 = arith.constant 0 : index
    %c0_22 = arith.constant 0 : index
    %34 = vector.load %arg6[%c0_21, %c0_22] : memref<8x4xf32, #tpu.memory_space<vmem>>, vector<8x4xf32>
    %35 = vector.extract_strided_slice %34 {offsets = [0, 0], sizes = [8, 1], strides = [1, 1]} : vector<8x4xf32> to vector<8x1xf32>
    %36 = vector.extract_strided_slice %33 {offsets = [0, 0], sizes = [1, 256], strides = [1, 1]} : vector<4x256xf32> to vector<1x256xf32>
    %37 = vector.broadcast %35 : vector<8x1xf32> to vector<8x256xf32>
    %38 = vector.broadcast %36 : vector<1x256xf32> to vector<8x256xf32>
    %39 = arith.mulf %37, %38 : vector<8x256xf32>
    %40 = vector.extract_strided_slice %34 {offsets = [0, 1], sizes = [8, 1], strides = [1, 1]} : vector<8x4xf32> to vector<8x1xf32>
    %41 = vector.extract_strided_slice %33 {offsets = [1, 0], sizes = [1, 256], strides = [1, 1]} : vector<4x256xf32> to vector<1x256xf32>
    %42 = vector.broadcast %40 : vector<8x1xf32> to vector<8x256xf32>
    %43 = vector.broadcast %41 : vector<1x256xf32> to vector<8x256xf32>
    %44 = arith.mulf %42, %43 : vector<8x256xf32>
    %45 = arith.addf %39, %44 : vector<8x256xf32>
    %46 = vector.extract_strided_slice %34 {offsets = [0, 2], sizes = [8, 1], strides = [1, 1]} : vector<8x4xf32> to vector<8x1xf32>
    %47 = vector.extract_strided_slice %33 {offsets = [2, 0], sizes = [1, 256], strides = [1, 1]} : vector<4x256xf32> to vector<1x256xf32>
    %48 = vector.broadcast %46 : vector<8x1xf32> to vector<8x256xf32>
    %49 = vector.broadcast %47 : vector<1x256xf32> to vector<8x256xf32>
    %50 = arith.mulf %48, %49 : vector<8x256xf32>
    %51 = arith.addf %45, %50 : vector<8x256xf32>
    %52 = vector.extract_strided_slice %34 {offsets = [0, 3], sizes = [8, 1], strides = [1, 1]} : vector<8x4xf32> to vector<8x1xf32>
    %53 = vector.extract_strided_slice %33 {offsets = [3, 0], sizes = [1, 256], strides = [1, 1]} : vector<4x256xf32> to vector<1x256xf32>
    %54 = vector.broadcast %52 : vector<8x1xf32> to vector<8x256xf32>
    %55 = vector.broadcast %53 : vector<1x256xf32> to vector<8x256xf32>
    %56 = arith.mulf %54, %55 : vector<8x256xf32>
    %57 = arith.addf %51, %56 : vector<8x256xf32>
    %c0_23 = arith.constant 0 : index
    %c0_24 = arith.constant 0 : index
    %58 = vector.load %arg7[%c0_23, %c0_24] : memref<128x512xf32, #tpu.memory_space<vmem>>, vector<128x512xf32>
    %59 = vector.extract_strided_slice %57 {offsets = [0, 0], sizes = [8, 128], strides = [1, 1]} : vector<8x256xf32> to vector<8x128xf32>
    %cst_25 = arith.constant dense<0.000000e+00> : vector<8x512xf32>
    %60 = tpu.matmul %59, %58, %cst_25 {dimension_numbers = #tpu.dot_dimension_numbers<[1], [0], [0], [1], [0, 0, 1, 1], [], []>} : vector<8x128xf32>, vector<128x512xf32>, vector<8x512xf32> -> vector<8x512xf32>
    %c0_26 = arith.constant 0 : index
    %c0_27 = arith.constant 0 : index
    %c0_28 = arith.constant 0 : index
    %61 = vector.load %arg9[%c0_26, %c0_27, %c0_28] : memref<1x8x1024xf32, #tpu.memory_space<vmem>>, vector<1x8x512xf32>
    %62 = vector.shape_cast %61 : vector<1x8x512xf32> to vector<8x512xf32>
    %63 = vector.shape_cast %60 : vector<8x512xf32> to vector<1x8x512xf32>
    tpu.vector_store %arg9[%c0_26, %c0_27, %c0_28], %63 {strides = array<i32>} : memref<1x8x1024xf32, #tpu.memory_space<vmem>>, vector<1x8x512xf32>,
    %64 = vector.extract_strided_slice %57 {offsets = [0, 128], sizes = [8, 128], strides = [1, 1]} : vector<8x256xf32> to vector<8x128xf32>
    %cst_29 = arith.constant dense<0.000000e+00> : vector<8x512xf32>
    %65 = tpu.matmul %64, %58, %cst_29 {dimension_numbers = #tpu.dot_dimension_numbers<[1], [0], [0], [1], [0, 0, 1, 1], [], []>} : vector<8x128xf32>, vector<128x512xf32>, vector<8x512xf32> -> vector<8x512xf32>
    %c0_30 = arith.constant 0 : index
    %c0_31 = arith.constant 0 : index
    %c512 = arith.constant 512 : index
    %66 = vector.load %arg9[%c0_30, %c0_31, %c512] : memref<1x8x1024xf32, #tpu.memory_space<vmem>>, vector<1x8x512xf32>
    %67 = vector.shape_cast %66 : vector<1x8x512xf32> to vector<8x512xf32>
    %68 = vector.shape_cast %65 : vector<8x512xf32> to vector<1x8x512xf32>
    tpu.vector_store %arg9[%c0_30, %c0_31, %c512], %68 {strides = array<i32>} : memref<1x8x1024xf32, #tpu.memory_space<vmem>>, vector<1x8x512xf32>,
    return
  }
  func.func @transform_0(%arg0: i32, %arg1: i32) -> (i32, i32, i32) {
    %c0_i32 = arith.constant 0 : i32
    %c0_i32_0 = arith.constant 0 : i32
    %c0_i32_1 = arith.constant 0 : i32
    %c0_i32_2 = arith.constant 0 : i32
    return %c0_i32, %c0_i32_0, %c0_i32_1 : i32, i32, i32
  }
  func.func @transform_1(%arg0: i32, %arg1: i32) -> (i32, i32, i32) {
    %c0_i32 = arith.constant 0 : i32
    %c0_i32_0 = arith.constant 0 : i32
    %c0_i32_1 = arith.constant 0 : i32
    %c0_i32_2 = arith.constant 0 : i32
    return %c0_i32, %c0_i32_0, %c0_i32_1 : i32, i32, i32
  }
  func.func @transform_2(%arg0: i32, %arg1: i32) -> (i32, i32) {
    %c0_i32 = arith.constant 0 : i32
    %c0_i32_0 = arith.constant 0 : i32
    %c0_i32_1 = arith.constant 0 : i32
    return %c0_i32, %c0_i32_0 : i32, i32
  }
  func.func @transform_3(%arg0: i32, %arg1: i32) -> (i32, i32) {
    %c0_i32 = arith.constant 0 : i32
    %c0_i32_0 = arith.constant 0 : i32
    %c0_i32_1 = arith.constant 0 : i32
    return %c0_i32, %c0_i32_0 : i32, i32
  }
  func.func @transform_4(%arg0: i32, %arg1: i32) -> (i32, i32) {
    %c0_i32 = arith.constant 0 : i32
    %c0_i32_0 = arith.constant 0 : i32
    %c0_i32_1 = arith.constant 0 : i32
    return %c0_i32, %c0_i32_0 : i32, i32
  }
  func.func @transform_5(%arg0: i32, %arg1: i32) -> (i32, i32) {
    %c0_i32 = arith.constant 0 : i32
    %c0_i32_0 = arith.constant 0 : i32
    %c0_i32_1 = arith.constant 0 : i32
    return %c0_i32, %c0_i32_0 : i32, i32
  }
  func.func @transform_6(%arg0: i32, %arg1: i32) -> (i32, i32, i32) {
    %c0_i32 = arith.constant 0 : i32
    %c0_i32_0 = arith.constant 0 : i32
    return %arg0, %c0_i32, %arg1 : i32, i32, i32
  }
  func.func @transform_7(%arg0: i32, %arg1: i32) -> (i32, i32, i32) {
    %c0_i32 = arith.constant 0 : i32
    %c0_i32_0 = arith.constant 0 : i32
    return %arg0, %c0_i32, %arg1 : i32, i32, i32
  }
}

</mosaic_0001>

<bundles_post_ra>
// kernel: gen_transition.2
= control target key start
LH: loop header
LB: loop body
LE: loop exit
PB: predicated region body
PF: predicated region fallthrough
CT: control target
= control target key end

     0   :  { %s391_s9 = smov 0   ;;  %s393_s10 = smov 0   ;;  %s427_s0 = inlined_call_operand.vmem [shape: f32[2,4,256], index: 0, kind: input, shape index: {}]   ;;  %s428_s1 = inlined_call_operand.vmem [shape: f32[2,4,1], index: 1, kind: output, shape index: {0}]   ;;  %s429_s2 = inlined_call_operand.vmem [shape: f32[2,4,1], index: 2, kind: output, shape index: {1}]  }
   0x1   :  { %s395_s11 = smov 0  }
   0x2 LB: > { %s25_s12 = sadd.s32 1, %s369_s10  ;;  %p318_p0 = scmp.ge.s32.totalorder %s373_s11, 1  ;;  %s373_s11 = sphi %s395_s11, %s13_s11   ;;  %s369_s10 = sphi %s393_s10, %s431_s10   ;;  %s365_s9 = sphi %s391_s9, %s430_s9  }
   0x3   : > { %p27_p1 = scmp.ge.s32.totalorder %s25_s12, 2  ;;  %p134_p2 = scmp.lt.s32.totalorder %s373_s11, 3 }
   0x5   : > { %s433_s12 = smov (%p27_p1, %s25_s12), 0  ;;  %p135_p3 = pnand %p318_p0, %p134_p2 }
   0x6   : > { %p164_p4 = scmp.lt.s32.totalorder (!%p135_p3), %s365_s9, 1  ;;  %v375_v0 = vmov (!%p135_p3), 0.0   ;;  %vm205_vm0 = vcmask (!%p135_p3), 1043456   ;;  %vm209_vm1 = vcmask (!%p135_p3), 3072  }
   0x7   : > { %138 = sbr.rel (%p135_p3) target bundleno = 180 (0xb4), region = 24  ;;  %185 = vst [vmem:[#allocation2] sm:$0xf] (!%p135_p3), %v375_v0  ;;  %186 = vst [vmem:[#allocation3] sm:$0xf] (!%p135_p3), %v375_v0 }
   0xe   : > { %s435_s9 = smov (!%p164_p4, %s365_s9), 1  ;;  %v195_v4 = vld [vmem:[#allocation2] sm:$0xf]  ;;  %v198_v7 = vld [vmem:[#allocation3] sm:$0xf] }
   0xf   : > { %s325_s13 = sshll.u32 %s435_s9, 3  ;;  %s321_s17 = sshll.u32 %s435_s9, 2 }
  0x10   : > { %s171_s16 = scalar_lea.vmem %s427_s0, %s325_s13  ;;  %s176_s20 = scalar_lea.vmem %s428_s1, %s321_s17 }
  0x11   : > { %v187_v1 = vld [vmem:[%s171_s16] sm:$0xff]  ;;  %s180_s23 = scalar_lea.vmem %s429_s2, %s321_s17 }
  0x12   : > { %v190_v2 = vrot.slane %v187_v1, 4  ;;  %v188_v3 = vmul.f32 %v187_v1, %v187_v1 }
  0x14   : > { %v192_v5 = vadd.f32 %v190_v2, %v187_v1  ;;  %v193_v6 = vmul.f32 %v190_v2, %v190_v2 }
  0x16   : > { %v196_v8 = vadd.f32 %v195_v4, %v192_v5  ;;  %v194_v9 = vadd.f32 %v193_v6, %v188_v3 }
  0x18   : > { %197 = vst [vmem:[#allocation2] sm:$0xf] %v196_v8  ;;  %v199_v10 = vadd.f32 %v198_v7, %v194_v9 }
  0x1a   : > { %200 = vst [vmem:[#allocation3] sm:$0xf] %v199_v10 }
  0x1f   : > { %v204_v11 = vld [vmem:[#allocation2] sm:$0xf] }
  0x20   : > { %v206_v12 = vsel %vm205_vm0, %v204_v11, 0.0 }
  0x21   : > { %207 = vadd.xlane.f32.xlu0 %v206_v12  ;;  %v211_v13 = vld [vmem:[#allocation3] sm:$0xf] }
  0x22   : > { %v212_v14 = vsel %vm205_vm0, %v211_v13, 0.0 }
  0x25   : > { %213 = vadd.xlane.f32.xlu0 %v212_v14 }
  0xae   : > { %v208_v15 = vpop.xlane.xlu0 %207 }
  0xaf   : > { %210 = vst.msk [vmem:[%s176_s20] sm:$0xf] %vm209_vm1, %v208_v15 }
  0xb2   : > { %v214_v16 = vpop.xlane.xlu0 %213 }
  0xb3   : > { %215 = vst.msk [vmem:[%s180_s23] sm:$0xf] %vm209_vm1, %v214_v16 }
  0xb4 PF: > { %s13_s11 = sadd.s32 1, %s373_s11   ;;  %s430_s9 = smov %s369_s10 }
  0xb5   : > { %p10_p5 = scmp.ge.s32.totalorder %s13_s11, 4   ;;  %s431_s10 = smov %s433_s12 }
  0xb7   :  { %12 = sbr.rel (!%p10_p5) target bundleno = 2 (0x2), region = 74 }

// kernel: gen_transition.3
= control target key start
LH: loop header
LB: loop body
LE: loop exit
PB: predicated region body
PF: predicated region fallthrough
CT: control target
= control target key end

     0   :  { %12 = vsyncpa [#allocation3], 0  ;;  %s1242_s24 = smov 0   ;;  %s1244_s25 = smov 0   ;;  %s1505_s0 = inlined_call_operand.vmem [shape: f32[2,4,1], index: 0, kind: input, shape index: {}]   ;;  %s1506_s1 = inlined_call_operand.vmem [shape: f32[2,4,1], index: 1, kind: input, shape index: {}]   ;;  %s1507_s2 = inlined_call_operand.vmem [shape: f32[4,1], index: 2, kind: input, shape index: {}]   ;;  %s1508_s3 = inlined_call_operand.vmem [shape: f32[4,1], index: 3, kind: input, shape index: {}]   ;;  %s1509_s4 = inlined_call_operand.vmem [shape: f32[8,4], index: 4, kind: input, shape index: {}]   ;;  %s1510_s5 = inlined_call_operand.hbm [shape: f32[128,512], index: 5, kind: input, shape index: {}]   ;;  %s1511_s6 = inlined_call_operand.vmem [shape: f32[2,4,256], index: 6, kind: input, shape index: {}]   ;;  %s1512_s7 = inlined_call_operand.vmem [shape: f32[2,8,1024], index: 7, kind: output, shape index: {}]  }
   0x1   :  { %s1246_s26 = smov 0  }
   0x2 LB: > { %s941_s27 = sadd.s32 4294967295, %s1191_s26   ;;  %s30_s28 = sadd.s32 1, %s1187_s25  ;;  %s1191_s26 = sphi %s1246_s26, %s18_s26   ;;  %s1187_s25 = sphi %s1244_s25, %s1522_s25   ;;  %s1183_s24 = sphi %s1242_s24, %s1521_s24  }
   0x3   : > { %p32_p0 = scmp.ge.s32.totalorder %s30_s28, 2  ;;  %p943_p1 = scmp.ge.s32.totalorder %s1191_s26, 1 }
   0x4   : > { %p217_p2 = scmp.lt.s32.totalorder %s1191_s26, 3  ;;  %p1267_p4 = scmp.eq.s32.totalorder %s941_s27, 0 }
   0x5   : > { %s1524_s28 = smov (%p32_p0, %s30_s28), 0  ;;  %s1193_s8 = smov [#allocation2]  }
   0x6   : > { %p1263_p3 = pnand %p943_p1, %p217_p2  ;;  %s244_s9 = sshll.u32 %s1193_s8, 4  ;;  %s245_s9 = int_to_ptr.vmem [resolvable:$true] %s244_s9 }
   0x7   : > { %s1517_s30 = scalar_select %p1267_p4, 1, 0 }
   0x8   : > { %s1516_s29 = scalar_select %p1263_p3, 1, 0 }
   0x9   : > { %p1090_p5 = pneg %p1263_p3  ;;  %s1137_s13 = scalar_lea.hbm %s1510_s5, 8192 }
   0xa   : > { %p1138_p7 = scmp.ne.s32.totalorder %s1510_s5, %s1137_s13  ;;  %p1144_p11 = scmp.lt.u32.totalorder %s1137_s13, %s1510_s5 }
   0xb   : > { %p1275_p6 = pnand %p1267_p4, %p1090_p5 }
   0xd   : > { %p1139_p8 = pneg %p1275_p6 }
   0xf   : > { %p1140_p9 = pnand %p1139_p8, %p1138_p7 }
  0x11   : > { %p1141_p10 = pneg %p1140_p9 }
  0x13   : > { %p1146_p12 = pnand %p1144_p11, %p1141_p10 }
  0x15   : > { %1149 = shalt.err (!%p1146_p12)
}
  0x16   : > { %s1150_s18 = scalar_lea.vmem %s245_s9, 8192  ;;  %p1158_p2 = scmp.lt.s32.totalorder %s245_s9, %s245_s9 }
  0x17   : > { %p1151_p13 = scmp.ne.s32.totalorder %s245_s9, %s1150_s18  ;;  %p1159_p5 = scmp.lt.s32.totalorder %s1150_s18, %s1150_s18 }
  0x19   : > { %p1153_p0 = pnand %p1151_p13, %p1139_p8  ;;  %p1160_p4 = por %p1159_p5, %p1158_p2 }
  0x1b   : > { %p1154_p1 = pneg %p1153_p0 }
  0x1d   : > { %p1161_p3 = pnand %p1160_p4, %p1154_p1 }
  0x1f   : > { %1164 = shalt.err (!%p1161_p3)
}
  0x20   : > { %s1194_s19 = smov 512   ;;  %s1195_s20 = smov 32  }
  0x21   : > { %1093 = dma.hbm_to_vmem [thread:$0]  (!%p1275_p6), %s1510_s5, 8192, %s245_s9, [#allocation3], %s1194_s19, %s1194_s19, %s1195_s20  }
  0x22   : > { %p1519_p7 = scmp.ne.s32.totalorder %s1516_s29, 0 }
  0x23   : > { %p1520_p9 = scmp.ne.s32.totalorder (!%p1519_p7), %s1517_s30, 0 }
  0x24   : > { %273 = sbr.rel (%p1519_p7) target bundleno = 467 (0x1d3), region = 48 }
  0x2b   : > { %1178 = dma.done.wait (%p1520_p9), [#allocation3], 8192  }
  0x2c   : > { %1180 = vsyncadd (%p1520_p9), [#allocation3], 4294959104  ;;  %v1196_v0 = vmov 0   ;;  %v333_v1 = vld [vmem:[%s1505_s0] sm:$0xf]  ;;  %v487_v8 = vld [vmem:[#allocation2 + $0x8] sm:$0xff] }
  0x2d   : > { %1129 = vset.pattern.permute.xlu0 %v1196_v0  ;;  %1130 = vset.pattern.permute.xlu1 %v1196_v0  ;;  %v334_v2 = vld [vmem:[%s1506_s1] sm:$0xf]  ;;  %v952_v3 = vld [vmem:[%s1505_s0 + $0x4] sm:$0xf]  ;;  %v491_v9 = vld [vmem:[#allocation2 + $0x28] sm:$0xff]  ;;  %v1197_v26 = vmov 1  }
  0x2e   : > { %v337_v4 = vadd.f32 %v952_v3, %v333_v1  ;;  %v953_v5 = vld [vmem:[%s1506_s1 + $0x4] sm:$0xf]  ;;  %v1321_v11 = vpack.c.bf16 %v491_v9, %v487_v8  ;;  %v489_v12 = vld [vmem:[#allocation2 + $0x18] sm:$0xff]  ;;  %v488_v18 = vld [vmem:[#allocation2 + $0x10] sm:$0xff]  ;;  %v1198_v49 = vmov 3   ;;  %p314_p3 = scmp.lt.s32.totalorder %s1183_s24, 1 }
  0x2f   : > { %v1316_v6 = vld [vmem:[%s1509_s4] sm:$0xff]  ;;  %v340_v7 = vadd.f32 %v953_v5, %v334_v2  ;;  %v493_v13 = vld [vmem:[#allocation2 + $0x38] sm:$0xff]  ;;  %v492_v19 = vld [vmem:[#allocation2 + $0x30] sm:$0xff] }
  0x30   : > { %384 = vperm.xlu1 %1130, %v1316_v6   ;;  %v1319_v10 = vmul.f32 0.001953125, %v337_v4  ;;  %v486_v14 = vld [vmem:[#allocation2] sm:$0xff]  ;;  %v1323_v16 = vpack.c.bf16 %v493_v13, %v489_v12  ;;  %959 = vmatprep.subr.bf16.mxu0 %v1321_v11  ;;  %v1330_v22 = vpack.c.bf16 %v492_v19, %v488_v18  ;;  %v495_v23 = vld [vmem:[#allocation2 + $0x48] sm:$0xff]  ;;  %v497_v25 = vld [vmem:[#allocation2 + $0x58] sm:$0xff]  ;;  %s1526_s24 = smov (!%p314_p3, %s1183_s24), 1 }
  0x31   : > { %v342_v15 = vmul.f32 0.001953125, %v340_v7  ;;  %v490_v17 = vld [vmem:[#allocation2 + $0x20] sm:$0xff]  ;;  %v499_v24 = vld [vmem:[#allocation2 + $0x68] sm:$0xff]  ;;  %v501_v28 = vld [vmem:[#allocation2 + $0x78] sm:$0xff]  ;;  %s956_s18 = sshll.u32 %s1526_s24, 3  ;;  %s957_s22 = sshll.u32 %s1526_s24, 6 }
  0x32   : > { %v343_v20 = vmul.f32 %v1319_v10, %v1319_v10  ;;  %v1328_v21 = vpack.c.bf16 %v490_v17, %v486_v14  ;;  %991 = vmatprep.subr.bf16.mxu1 %v1323_v16  ;;  %v1333_v27 = vpack.c.bf16 %v499_v24, %v495_v23  ;;  %v494_v29 = vld [vmem:[#allocation2 + $0x40] sm:$0xff]  ;;  %v1337_v32 = vpack.c.bf16 %v501_v28, %v497_v25  ;;  %v496_v34 = vld [vmem:[#allocation2 + $0x50] sm:$0xff]  ;;  %v503_v36 = vld [vmem:[#allocation2 + $0x88] sm:$0xff]  ;;  %s321_s21 = scalar_lea.vmem %s1511_s6, %s956_s18  ;;  %s331_s8 = scalar_lea.vmem %s1512_s7, %s957_s22 }
  0x33   : > { %v498_v30 = vld [vmem:[#allocation2 + $0x60] sm:$0xff]  ;;  %v500_v35 = vld [vmem:[#allocation2 + $0x70] sm:$0xff]  ;;  %993 = vmatpush1.bf16.msra.mxu1 %v1330_v22  ;;  %v507_v38 = vld [vmem:[#allocation2 + $0xa8] sm:$0xff] }
  0x34   : > { %1131 = vset.pattern.permute.xlu1 %v1197_v26  ;;  %v344_v31 = vsub.f32 %v342_v15, %v343_v20  ;;  %961 = vmatpush1.bf16.msra.mxu0 %v1328_v21  ;;  %v1339_v33 = vpack.c.bf16 %v498_v30, %v494_v29  ;;  %v1343_v37 = vpack.c.bf16 %v500_v35, %v496_v34  ;;  %v505_v39 = vld [vmem:[#allocation2 + $0x98] sm:$0xff]  ;;  %v502_v44 = vld [vmem:[#allocation2 + $0x80] sm:$0xff]  ;;  %v504_v46 = vld [vmem:[#allocation2 + $0x90] sm:$0xff] }
  0x35   : > { %409 = vperm.xlu1 %1131, %v1316_v6   ;;  %963 = vmatprep.subr.bf16.mxu0 %v1333_v27  ;;  %v509_v40 = vld [vmem:[#allocation2 + $0xb8] sm:$0xff]  ;;  %v1346_v42 = vpack.c.bf16 %v507_v38, %v503_v36  ;;  %v506_v45 = vld [vmem:[#allocation2 + $0xa0] sm:$0xff]  ;;  %v508_v47 = vld [vmem:[#allocation2 + $0xb0] sm:$0xff] }
  0x36   : > { %v345_v41 = vmax.f32 %v344_v31, 0.0  ;;  %995 = vmatprep.subr.bf16.mxu1 %v1337_v32  ;;  %v1348_v43 = vpack.c.bf16 %v509_v40, %v505_v39  ;;  %v1352_v50 = vpack.c.bf16 %v506_v45, %v502_v44  ;;  %v1356_v51 = vpack.c.bf16 %v508_v47, %v504_v46  ;;  %v346_v52 = vld [vmem:[%s1507_s2] sm:$0xf]  ;;  %v511_v56 = vld [vmem:[#allocation2 + $0xc8] sm:$0xff]  ;;  %v513_v58 = vld [vmem:[#allocation2 + $0xd8] sm:$0xff] }
  0x37   : > { %997 = vmatpush1.bf16.msra.mxu1 %v1343_v37  ;;  %v350_v54 = vld [vmem:[%s1508_s3] sm:$0xf]  ;;  %v515_v57 = vld [vmem:[#allocation2 + $0xe8] sm:$0xff]  ;;  %v517_v60 = vld [vmem:[#allocation2 + $0xf8] sm:$0xff]  ;;  %v1199_v31 = vmov 2  }
  0x38   : > { %v347_v48 = vadd.f32 1e-05, %v345_v41  ;;  %965 = vmatpush1.bf16.msra.mxu0 %v1339_v33  ;;  %999 = vmatprep.subr.bf16.mxu1 %v1348_v43  ;;  %v1368_v59 = vpack.c.bf16 %v515_v57, %v511_v56  ;;  %v510_v61 = vld [vmem:[#allocation2 + $0xc0] sm:$0xff]  ;;  %v1371_v0 = vpack.c.bf16 %v517_v60, %v513_v58  ;;  %v512_v2 = vld [vmem:[#allocation2 + $0xd0] sm:$0xff]  ;;  %v519_v7 = vld [vmem:[#allocation2 + $0x108] sm:$0xff] }
  0x39   : > { %1133 = vset.pattern.permute.xlu1 %v1198_v49  ;;  %967 = vmatprep.subr.bf16.mxu0 %v1346_v42  ;;  %v514_v62 = vld [vmem:[#allocation2 + $0xe0] sm:$0xff]  ;;  %v516_v3 = vld [vmem:[#allocation2 + $0xf0] sm:$0xff]  ;;  %v523_v8 = vld [vmem:[#allocation2 + $0x128] sm:$0xff] }
  0x3a   : > { %461 = vperm.xlu1 %1133, %v1316_v6   ;;  %1135 = vrsqrt.f32 %v347_v48  ;;  %v1373_v1 = vpack.c.bf16 %v514_v62, %v510_v61  ;;  %v1376_v4 = vpack.c.bf16 %v516_v3, %v512_v2  ;;  %v521_v9 = vld [vmem:[#allocation2 + $0x118] sm:$0xff]  ;;  %v518_v13 = vld [vmem:[#allocation2 + $0x100] sm:$0xff]  ;;  %v520_v18 = vld [vmem:[#allocation2 + $0x110] sm:$0xff] }
  0x3b   : > { %1001 = vmatpush1.bf16.msra.mxu1 %v1356_v51  ;;  %v525_v12 = vld [vmem:[#allocation2 + $0x138] sm:$0xff]  ;;  %v522_v14 = vld [vmem:[#allocation2 + $0x120] sm:$0xff]  ;;  %v524_v19 = vld [vmem:[#allocation2 + $0x130] sm:$0xff] }
  0x3c   : > { %969 = vmatpush1.bf16.msra.mxu0 %v1352_v50  ;;  %1003 = vmatprep.subr.bf16.mxu1 %v1371_v0  ;;  %v1383_v15 = vpack.c.bf16 %v525_v12, %v521_v9  ;;  %v1385_v17 = vpack.c.bf16 %v522_v14, %v518_v13  ;;  %v1388_v20 = vpack.c.bf16 %v524_v19, %v520_v18  ;;  %v527_v23 = vld [vmem:[#allocation2 + $0x148] sm:$0xff]  ;;  %v529_v25 = vld [vmem:[#allocation2 + $0x158] sm:$0xff]  ;;  %v526_v29 = vld [vmem:[#allocation2 + $0x140] sm:$0xff]  ;;  %v1201_v9 = vmov 839922192  }
  0x3d   : > { %971 = vmatprep.subr.bf16.mxu0 %v1368_v59  ;;  %v531_v24 = vld [vmem:[#allocation2 + $0x168] sm:$0xff]  ;;  %v533_v28 = vld [vmem:[#allocation2 + $0x178] sm:$0xff]  ;;  %v530_v30 = vld [vmem:[#allocation2 + $0x160] sm:$0xff]  ;;  %v359_v12 = vunpack.c.l.s4 %v1201_v9  ;;  %v361_v13 = vlaneseq }
  0x3e   : > { %v1393_v26 = vpack.c.bf16 %v531_v24, %v527_v23  ;;  %v1395_v34 = vpack.c.bf16 %v533_v28, %v529_v25  ;;  %v528_v35 = vld [vmem:[#allocation2 + $0x150] sm:$0xff]  ;;  %v1399_v38 = vpack.c.bf16 %v530_v30, %v526_v29  ;;  %v535_v40 = vld [vmem:[#allocation2 + $0x188] sm:$0xff]  ;;  %v537_v44 = vld [vmem:[#allocation2 + $0x198] sm:$0xff] }
  0x3f   : > { %1005 = vmatpush1.bf16.msra.mxu1 %v1376_v4  ;;  %v532_v36 = vld [vmem:[#allocation2 + $0x170] sm:$0xff]  ;;  %v539_v41 = vld [vmem:[#allocation2 + $0x1a8] sm:$0xff]  ;;  %v541_v46 = vld [vmem:[#allocation2 + $0x1b8] sm:$0xff]  ;;  %v360_v14 = vunpack.c.0.s8 %v359_v12  ;;  %v1437_v18 = vshrl.u32 %v361_v13, 7 }
  0x40   : > { %973 = vmatpush1.bf16.msra.mxu0 %v1373_v1  ;;  %1007 = vmatprep.subr.bf16.mxu1 %v1383_v15  ;;  %v1401_v39 = vpack.c.bf16 %v532_v36, %v528_v35  ;;  %v1406_v45 = vpack.c.bf16 %v539_v41, %v535_v40  ;;  %v1408_v47 = vpack.c.bf16 %v541_v46, %v537_v44  ;;  %v538_v48 = vld [vmem:[#allocation2 + $0x1a0] sm:$0xff]  ;;  %v543_v56 = vld [vmem:[#allocation2 + $0x1c8] sm:$0xff]  ;;  %v545_v58 = vld [vmem:[#allocation2 + $0x1d8] sm:$0xff] }
  0x41   : > { %v547_v57 = vld [vmem:[#allocation2 + $0x1e8] sm:$0xff]  ;;  %v549_v61 = vld [vmem:[#allocation2 + $0x1f8] sm:$0xff]  ;;  %v542_v62 = vld [vmem:[#allocation2 + $0x1c0] sm:$0xff]  ;;  %v363_v19 = vsub.s32 %v360_v14, %v1437_v18  ;;  %v414_v35 = vsub.s32 1, %v1437_v18  ;;  %v1447_v36 = vsub.s32 3, %v1437_v18  ;;  %v1450_v40 = vsub.s32 2, %v1437_v18 }
  0x42   : > { %v1419_v60 = vpack.c.bf16 %v547_v57, %v543_v56  ;;  %v1421_v2 = vpack.c.bf16 %v549_v61, %v545_v58  ;;  %v544_v3 = vld [vmem:[#allocation2 + $0x1d0] sm:$0xff] }
  0x43   : > { %1009 = vmatpush1.bf16.msra.mxu1 %v1388_v20 }
  0x44   : > { %v1136_v53 = vpop.eup %1135  ;;  %1011 = vmatprep.subr.bf16.mxu1 %v1395_v34 }
  0x45   : > { %v349_v55 = vmul.f32 %v1136_v53, %v346_v52  ;;  %v536_v52 = vld [vmem:[#allocation2 + $0x190] sm:$0xff] }
  0x47   : > { %356 = vperm.xlu0 %1129, %v349_v55   ;;  %v351_v63 = vmul.f32 %v349_v55, %v1319_v10  ;;  %v1381_v10 = vpack.c.bf16 %v523_v8, %v519_v7  ;;  %1013 = vmatpush1.bf16.msra.mxu1 %v1401_v39  ;;  %v1200_v8 = vmov 0.0  }
  0x48   : > { %1015 = vmatprep.subr.bf16.mxu1 %v1408_v47  ;;  %614 = vmatprep.mubr.f32.mxu0 %v1200_v8 }
  0x49   : > { %v352_v5 = vsub.f32 %v350_v54, %v351_v63  ;;  %975 = vmatprep.subr.bf16.mxu0 %v1381_v10  ;;  %v540_v54 = vld [vmem:[#allocation2 + $0x1b0] sm:$0xff]  ;;  %v546_v63 = vld [vmem:[#allocation2 + $0x1e0] sm:$0xff]  ;;  %685 = vmatprep.mubr.f32.mxu1 %v1200_v8 }
  0x4a   : > { %977 = vmatpush1.bf16.msra.mxu0 %v1385_v17  ;;  %v1415_v55 = vpack.c.bf16 %v540_v54, %v536_v52 }
  0x4b   : > { %369 = vperm.xlu0 %1129, %v352_v5   ;;  %979 = vmatprep.subr.bf16.mxu0 %v1393_v26  ;;  %v548_v5 = vld [vmem:[#allocation2 + $0x1f0] sm:$0xff] }
  0x4c   : > { %1017 = vmatpush1.bf16.msra.mxu1 %v1415_v55  ;;  %v1426_v7 = vpack.c.bf16 %v548_v5, %v544_v3 }
  0x4d   : > { %1019 = vmatprep.subr.bf16.mxu1 %v1421_v2 }
  0x4e   : > { %981 = vmatpush1.bf16.msra.mxu0 %v1399_v38 }
  0x4f   : > { %1132 = vset.pattern.permute.xlu0 %v1199_v31  ;;  %983 = vmatprep.subr.bf16.mxu0 %v1406_v45  ;;  %v390_v31 = vsub.s32 0, %v1437_v18 }
  0x50   : > { %435 = vperm.xlu0 %1132, %v1316_v6   ;;  %v534_v6 = vld [vmem:[#allocation2 + $0x180] sm:$0xff]  ;;  %1021 = vmatpush1.bf16.msra.mxu1 %v1426_v7 }
  0x51   : > { %v1411_v53 = vpack.c.bf16 %v538_v48, %v534_v6  ;;  %1055 = vmatprep.subr.bf16.mxu1 %v1323_v16  ;;  %v353_v16 = vld [vmem:[%s321_s21] sm:$0xff] }
  0x53   : > { %985 = vmatpush1.bf16.msra.mxu0 %v1411_v53 }
  0x54   : > { %1134 = vset.pattern.permute.xlu0 %v1198_v49  ;;  %v1423_v49 = vpack.c.bf16 %v546_v63, %v542_v62  ;;  %987 = vmatprep.subr.bf16.mxu0 %v1419_v60 }
  0x57   : > { %989 = vmatpush1.bf16.msra.mxu0 %v1423_v49 }
  0x58   : > { %1023 = vmatprep.subr.bf16.mxu0 %v1321_v11 }
  0xaf   : > { %v385_v25 = vpop.permute.xlu1 %384 }
  0xb4   : > { %v410_v44 = vpop.permute.xlu1 %409 }
  0xb9   : > { %v462_v3 = vpop.permute.xlu1 %461 }
  0xc6   : > { %v357_v11 = vpop.permute.xlu0 %356 }
  0xc7   : > { %v364_v23 = vrot.slane %v357_v11, %v363_v19  ;;  %v418_v11 = vsub.s32 5, %v1437_v18 }
  0xc9   : > { %v366_v28 = vmul.f32 %v364_v23, %v353_v16 }
  0xca   : > { %v370_v24 = vpop.permute.xlu0 %369 }
  0xcb   : > { %v377_v29 = vrot.slane %v370_v24, %v363_v19  ;;  %v394_v19 = vsub.s32 4, %v1437_v18 }
  0xcd   : > { %v379_v30 = vadd.f32 %v377_v29, %v366_v28 }
  0xcf   : > { %v380_v41 = vmax.f32 %v379_v30, 0.0  ;;  %v436_v58 = vpop.permute.xlu0 %435 }
  0xd1   : > { %v391_v46 = vrot.slane %v380_v41, %v390_v31  ;;  %v415_v6 = vrot.slane %v380_v41, %v414_v35  ;;  %v467_v48 = vrot.slane %v380_v41, %v1447_v36  ;;  %v441_v52 = vrot.slane %v380_v41, %v1450_v40 }
  0xd3   : > { %v401_v54 = vrot.slane %v391_v46, %v390_v31  ;;  %v425_v56 = vrot.slane %v415_v6, %v414_v35  ;;  %v451_v57 = vrot.slane %v441_v52, %v1450_v40  ;;  %v477_v63 = vrot.slane %v467_v48, %v1447_v36 }
  0xd5   : > { %v406_v61 = vmul.f32 %v401_v54, %v385_v25  ;;  %v430_v62 = vmul.f32 %v425_v56, %v410_v44  ;;  %v456_v9 = vmul.f32 %v451_v57, %v436_v58  ;;  %v482_v12 = vmul.f32 %v477_v63, %v462_v3 }
  0xd7   : > { %v432_v5 = vadd.f32 %v430_v62, %v406_v61 }
  0xd9   : > { %v458_v13 = vadd.f32 %v456_v9, %v432_v5 }
  0xdb   : > { %v484_v14 = vadd.f32 %v482_v12, %v458_v13 }
  0xdd   : > { %615 = vmatmul.mubr.f32.vlgmr.msra.gmra.mrb[0].mxu0 %v484_v14  ;;  %686 = vmatmul.mubr.f32.vlgmr.msra.gmra.mrb[0].mxu1 %v484_v14 }
  0xde   : > { %1025 = vmatpush1.bf16.msra.mxu0 %v1328_v21  ;;  %1057 = vmatpush1.bf16.msra.mxu1 %v1330_v22  ;;  %v395_v21 = vrot.slane %v380_v41, %v394_v19  ;;  %v419_v22 = vrot.slane %v380_v41, %v418_v11 }
  0xdf   : > { %1027 = vmatprep.subr.bf16.mxu0 %v1333_v27  ;;  %1059 = vmatprep.subr.bf16.mxu1 %v1337_v32  ;;  %v444_v27 = vsub.s32 6, %v1437_v18 }
  0xe0   : > { %760 = vmatprep.mubr.f32.mxu0 %v1200_v8  ;;  %831 = vmatprep.mubr.f32.mxu1 %v1200_v8  ;;  %v405_v32 = vrot.slane %v395_v21, %v390_v31 }
  0xe2   : > { %1029 = vmatpush1.bf16.msra.mxu0 %v1339_v33  ;;  %1061 = vmatpush1.bf16.msra.mxu1 %v1343_v37  ;;  %v429_v33 = vrot.slane %v419_v22, %v414_v35  ;;  %v470_v37 = vsub.s32 7, %v1437_v18 }
  0xe3   : > { %1031 = vmatprep.subr.bf16.mxu0 %v1346_v42  ;;  %1063 = vmatprep.subr.bf16.mxu1 %v1348_v43  ;;  %v445_v42 = vrot.slane %v380_v41, %v444_v27  ;;  %v407_v43 = vmul.f32 %v405_v32, %v385_v25 }
  0xe6   : > { %1033 = vmatpush1.bf16.msra.mxu0 %v1352_v50  ;;  %1065 = vmatpush1.bf16.msra.mxu1 %v1356_v51  ;;  %v431_v50 = vmul.f32 %v429_v33, %v410_v44  ;;  %v471_v51 = vrot.slane %v380_v41, %v470_v37 }
  0xe7   : > { %1035 = vmatprep.subr.bf16.mxu0 %v1368_v59  ;;  %1067 = vmatprep.subr.bf16.mxu1 %v1371_v0  ;;  %v455_v59 = vrot.slane %v445_v42, %v1450_v40 }
  0xe8   : > { %v433_v0 = vadd.f32 %v431_v50, %v407_v43 }
  0xea   : > { %1037 = vmatpush1.bf16.msra.mxu0 %v1373_v1  ;;  %1069 = vmatpush1.bf16.msra.mxu1 %v1376_v4  ;;  %v481_v1 = vrot.slane %v471_v51, %v1447_v36  ;;  %v457_v4 = vmul.f32 %v455_v59, %v436_v58 }
  0xeb   : > { %1039 = vmatprep.subr.bf16.mxu0 %v1381_v10  ;;  %1071 = vmatprep.subr.bf16.mxu1 %v1383_v15 }
  0xec   : > { %v459_v10 = vadd.f32 %v457_v4, %v433_v0  ;;  %v483_v15 = vmul.f32 %v481_v1, %v462_v3 }
  0xee   : > { %1041 = vmatpush1.bf16.msra.mxu0 %v1385_v17  ;;  %1073 = vmatpush1.bf16.msra.mxu1 %v1388_v20  ;;  %v485_v17 = vadd.f32 %v483_v15, %v459_v10 }
  0xef   : > { %1043 = vmatprep.subr.bf16.mxu0 %v1393_v26  ;;  %1075 = vmatprep.subr.bf16.mxu1 %v1395_v34 }
  0xf2   : > { %1045 = vmatpush1.bf16.msra.mxu0 %v1399_v38  ;;  %1077 = vmatpush1.bf16.msra.mxu1 %v1401_v39 }
  0xf3   : > { %1047 = vmatprep.subr.bf16.mxu0 %v1406_v45  ;;  %1079 = vmatprep.subr.bf16.mxu1 %v1408_v47 }
  0xf6   : > { %1049 = vmatpush1.bf16.msra.mxu0 %v1411_v53  ;;  %1081 = vmatpush1.bf16.msra.mxu1 %v1415_v55 }
  0xf7   : > { %1051 = vmatprep.subr.bf16.mxu0 %v1419_v60  ;;  %1083 = vmatprep.subr.bf16.mxu1 %v1421_v2 }
  0xfa   : > { %1053 = vmatpush1.bf16.msra.mxu0 %v1423_v49  ;;  %1085 = vmatpush1.bf16.msra.mxu1 %v1426_v7 }
  0xfd   : > { %761 = vmatmul.mubr.f32.vlgmr.msra.gmra.mrb[2].mxu0 %v485_v17  ;;  %832 = vmatmul.mubr.f32.vlgmr.msra.gmra.mrb[2].mxu1 %v485_v17 }
 0x1b0   : > { %v616_v20 = vpop.f32.mrb[0].mxu0  ;;  %v687_v26 = vpop.f32.mrb[0].mxu1 }
 0x1b1   : > { %692 = vst [vmem:[%s331_s8] sm:$0xff] %v616_v20  ;;  %694 = vst [vmem:[%s331_s8 + $0x10] sm:$0xff] %v687_v26  ;;  %v618_v34 = vpop.f32.mrb[1].mxu0  ;;  %v689_v38 = vpop.f32.mrb[1].mxu1 }
 0x1b2   : > { %693 = vst [vmem:[%s331_s8 + $0x8] sm:$0xff] %v618_v34  ;;  %695 = vst [vmem:[%s331_s8 + $0x18] sm:$0xff] %v689_v38 }
 0x1d0   : > { %v762_v39 = vpop.f32.mrb[2].mxu0  ;;  %v833_v45 = vpop.f32.mrb[2].mxu1 }
 0x1d1   : > { %838 = vst [vmem:[%s331_s8 + $0x20] sm:$0xff] %v762_v39  ;;  %840 = vst [vmem:[%s331_s8 + $0x30] sm:$0xff] %v833_v45  ;;  %v764_v47 = vpop.f32.mrb[3].mxu0  ;;  %v835_v53 = vpop.f32.mrb[3].mxu1 }
 0x1d2   : > { %839 = vst [vmem:[%s331_s8 + $0x28] sm:$0xff] %v764_v47  ;;  %841 = vst [vmem:[%s331_s8 + $0x38] sm:$0xff] %v835_v53 }
 0x1d3 PF: > { %s18_s26 = sadd.s32 1, %s1191_s26   ;;  %s1521_s24 = smov %s1187_s25 }
 0x1d4   : > { %p15_p4 = scmp.ge.s32.totalorder %s18_s26, 4   ;;  %s1522_s25 = smov %s1524_s28 }
 0x1d6   :  { %17 = sbr.rel (!%p15_p4) target bundleno = 2 (0x2), region = 85 }
 0x1dd   :  { %872 = vsyncpa [#allocation3], 1 }
 0x1de   :  { %874 = vsyncpa [#allocation3 + $0x1], 1 }

</bundles_post_ra>
